<compile_context>
chip_gen: v7x
topology: tpu7x:2x2x1
jax: 0.10.0
libtpu: 0.0.40
codegen_flags: <defaults>
</compile_context>

<pallas_src>
import functools

import jax
import jax.numpy as jnp
from jax.experimental import pallas as pl
from jax.experimental.pallas import tpu as pltpu

LEAKY_SLOPE = 0.01  # nn.LeakyReLU() default negative_slope


def _round_up(x, m):
    return -(-x // m) * m


def _matmul_bias_act_kernel(x_ref, w_ref, b_ref, o_ref, *, apply_act):
    """One (C_out-tile, row-tile) grid step: o = leaky_relu(x @ w + b)."""
    acc = jnp.dot(x_ref[...], w_ref[...], preferred_element_type=jnp.float32)
    acc = acc + b_ref[...]
    if apply_act:
        acc = jnp.where(acc >= 0, acc, LEAKY_SLOPE * acc)
    o_ref[...] = acc.astype(o_ref.dtype)


def conv_kx1(x, w, b, *, stride, pad, apply_act, max_tm=256, max_tn=512):
    """Conv2d with kernel (K, 1), stride (stride, 1), zero padding (pad, 0).

    x: (BP, H, C_in) f32  (one sequence per (batch, period-column))
    w: (C_out, C_in, K); b: (C_out,)
    Returns (BP, H_out, C_out) f32.
    """
    BP, H, C_in = x.shape
    C_out, _, K = w.shape
    H_out = (H + 2 * pad - K) // stride + 1

    # ---- im2col (strided slices + stack; pure layout plumbing in XLA) -------
    rows_needed = (H_out - 1) * stride + K
    back = max(rows_needed - (H + pad), 0)
    x_pad = jnp.pad(x, ((0, 0), (pad, back), (0, 0)))
    taps = [x_pad[:, dh:dh + (H_out - 1) * stride + 1:stride, :] for dh in range(K)]
    x_col = jnp.stack(taps, axis=2)                       # (BP, H_out, K, C_in)

    Kc = K * C_in
    M = BP * H_out
    x_col = x_col.reshape(M, Kc).astype(jnp.bfloat16)
    # w_col[dh*C_in + c, co] = w[co, c, dh]  (matches x_col's (dh, c) order)
    w_col = jnp.transpose(w, (2, 1, 0)).reshape(Kc, C_out).astype(jnp.bfloat16)
    b_row = b.reshape(1, C_out).astype(jnp.float32)

    # Pad the contraction dim to a sublane multiple (zeros contribute nothing).
    Kc_pad = _round_up(Kc, 16)
    if Kc_pad != Kc:
        x_col = jnp.pad(x_col, ((0, 0), (0, Kc_pad - Kc)))
        w_col = jnp.pad(w_col, ((0, Kc_pad - Kc), (0, 0)))

    # Row (M) tiling: big lane-dense tiles, padded rows are sliced off below.
    tm = max_tm if M >= max_tm else _round_up(M, 8)
    Mt = -(-M // tm)
    M_pad = Mt * tm
    if M_pad != M:
        x_col = jnp.pad(x_col, ((0, M_pad - M), (0, 0)))

    # C_out tiling: keeps the resident weight block <= ~5 MiB bf16.
    tn = max_tn if (C_out > max_tn and C_out % max_tn == 0) else C_out
    Nt = C_out // tn

    out = pl.pallas_call(
        functools.partial(_matmul_bias_act_kernel, apply_act=apply_act),
        out_shape=jax.ShapeDtypeStruct((M_pad, C_out), jnp.float32),
        grid=(Nt, Mt),                            # rows fastest -> weight block resident
        in_specs=[
            pl.BlockSpec((tm, Kc_pad), lambda n, m: (m, 0)),   # activations
            pl.BlockSpec((Kc_pad, tn), lambda n, m: (0, n)),   # weights
            pl.BlockSpec((1, tn), lambda n, m: (0, n)),        # bias
        ],
        out_specs=pl.BlockSpec((tm, tn), lambda n, m: (m, n)),
        compiler_params=pltpu.CompilerParams(
            dimension_semantics=("parallel", "parallel"),
            vmem_limit_bytes=32 * 1024 * 1024,
        ),
    )(x_col, w_col, b_row)

    if M_pad != M:
        out = out[:M]
    return out.reshape(BP, H_out, C_out)


def init_sub_params(key):
    """Deterministic params matching MPDSubDiscriminator.__init__ shapes."""
    out_list = [32, 128, 512, 1024]
    cfgs = []
    for i, oc in enumerate(out_list):
        ic = 1 if i == 0 else out_list[i - 1]
        cfgs.append(dict(ic=ic, oc=oc, k=5, stride=3, pad=2, act=True))
    # conv_layers[4]: 1024->1024, kernel (5,1), padding 'same' (pad=2), stride 1
    cfgs.append(dict(ic=1024, oc=1024, k=5, stride=1, pad=2, act=True))
    # end_conv: 1024->1, kernel (3,1), padding 'same' (pad=1), stride 1, no act
    cfgs.append(dict(ic=1024, oc=1, k=3, stride=1, pad=1, act=False))

    params = []
    for cfg in cfgs:
        key, kw, kb = jax.random.split(key, 3)
        fan_in = cfg["ic"] * cfg["k"]                 # kernel is (k, 1)
        bound = 1.0 / float(fan_in) ** 0.5
        w = jax.random.uniform(
            kw, (cfg["oc"], cfg["ic"], cfg["k"]), jnp.float32, -bound, bound
        )
        b = jax.random.uniform(kb, (cfg["oc"],), jnp.float32, -bound, bound)
        params.append((w, b, cfg))
    return params


def mpd_sub_discriminator(x, params, period):
    """x: (B, 1, T) as in PyTorch. Returns (x_flat, fmaps) like the module."""
    B, _, T = x.shape
    if T % period:
        x = jnp.pad(x, ((0, 0), (0, 0), (0, period - T % period)), mode="reflect")
        T = x.shape[-1]
    H = T // period
    # NCHW (B, 1, H, P)  ->  (B*P, H, 1): one sequence per period column.
    cur = jnp.transpose(x.reshape(B, H, period), (0, 2, 1)).reshape(B * period, H, 1)

    fmaps = []
    for (w, b, cfg) in params:
        cur = conv_kx1(
            cur, w, b, stride=cfg["stride"], pad=cfg["pad"], apply_act=cfg["act"]
        )
        Ho, Co = cur.shape[1], cur.shape[2]
        fm = jnp.transpose(cur.reshape(B, period, Ho, Co), (0, 3, 2, 1))  # NCHW
        fmaps.append(fm)

    out = fmaps[-1]                       # (B, 1, H_last, P), end_conv (no act)
    return out.reshape(B, 1, -1), fmaps   # flatten(-2, -1)


def mpd(x, params_list, periods):
    preds, fmaps = [], []
    for params, period in zip(params_list, periods):
        p, f = mpd_sub_discriminator(x, params, period)
        preds.append(p)
        fmaps.append(f)
    return preds, fmaps


if __name__ == "__main__":
    key = jax.random.PRNGKey(0)
    kx, kp = jax.random.split(key)

    B, T = 2, 64
    periods = (2, 3)                      # 64 % 3 != 0 -> exercises reflect pad
    x = jax.random.normal(kx, (B, 1, T), jnp.float32)

    pkeys = jax.random.split(kp, len(periods))
    params_list = [init_sub_params(k) for k in pkeys]

    preds, fmaps = mpd(x, params_list, periods)
    jax.block_until_ready((preds, fmaps))

    assert len(preds) == len(periods) and len(fmaps) == len(periods)
    for period, pred, fmap in zip(periods, preds, fmaps):
        assert len(fmap) == 6
        Bo, Co, Ho, Po = fmap[-1].shape
        assert (Bo, Co, Po) == (B, 1, period)
        assert pred.shape == (B, 1, Ho * period)
        for f in fmap:
            assert f.shape[0] == B and f.shape[3] == period
    print("KERNEL_OK")
</pallas_src>

<mosaic_0001>
module attributes {stable_mosaic.version = 11 : i64} {
  func.func @_matmul_bias_act_kernel(%arg0: i32, %arg1: i32, %arg2: memref<48x16xbf16, #tpu.memory_space<vmem>>, %arg3: memref<16x32xbf16, #tpu.memory_space<vmem>>, %arg4: memref<1x32xf32, #tpu.memory_space<vmem>>, %arg5: memref<48x32xf32, #tpu.memory_space<vmem>>) attributes {dimension_semantics = [#tpu.dimension_semantics<parallel>, #tpu.dimension_semantics<parallel>], iteration_bounds = array<i64: 1, 1>, scalar_prefetch = 0 : i64, scratch_operands = 0 : i64, tpu.core_type = #tpu.core_type<tc>, window_params = [{transform_indices = @transform_0, window_bounds = array<i64: 48, 16>}, {transform_indices = @transform_1, window_bounds = array<i64: 16, 32>}, {transform_indices = @transform_2, window_bounds = array<i64: 1, 32>}, {transform_indices = @transform_3, window_bounds = array<i64: 48, 32>}]} {
    %c0 = arith.constant 0 : index
    %c0_0 = arith.constant 0 : index
    %0 = vector.load %arg2[%c0, %c0_0] : memref<48x16xbf16, #tpu.memory_space<vmem>>, vector<48x16xbf16>
    %c0_1 = arith.constant 0 : index
    %c0_2 = arith.constant 0 : index
    %1 = vector.load %arg3[%c0_1, %c0_2] : memref<16x32xbf16, #tpu.memory_space<vmem>>, vector<16x32xbf16>
    %cst = arith.constant dense<0.000000e+00> : vector<48x32xf32>
    %2 = tpu.matmul %0, %1, %cst {dimension_numbers = #tpu.dot_dimension_numbers<[1], [0], [0], [1], [0, 0, 1, 1], [], []>} : vector<48x16xbf16>, vector<16x32xbf16>, vector<48x32xf32> -> vector<48x32xf32>
    %c0_3 = arith.constant 0 : index
    %c0_4 = arith.constant 0 : index
    %3 = vector.load %arg4[%c0_3, %c0_4] : memref<1x32xf32, #tpu.memory_space<vmem>>, vector<1x32xf32>
    %4 = vector.broadcast %3 : vector<1x32xf32> to vector<48x32xf32>
    %5 = arith.addf %2, %4 : vector<48x32xf32>
    %cst_5 = arith.constant 0.000000e+00 : f32
    %6 = vector.broadcast %cst_5 : f32 to vector<48x32xf32>
    %7 = arith.cmpf oge, %5, %6 : vector<48x32xf32>
    %cst_6 = arith.constant 0.00999999977 : f32
    %8 = vector.broadcast %cst_6 : f32 to vector<48x32xf32>
    %9 = arith.mulf %8, %5 : vector<48x32xf32>
    %10 = arith.select %7, %5, %9 : vector<48x32xi1>, vector<48x32xf32>
    %c0_7 = arith.constant 0 : index
    %c0_8 = arith.constant 0 : index
    %11 = vector.load %arg5[%c0_7, %c0_8] : memref<48x32xf32, #tpu.memory_space<vmem>>, vector<48x32xf32>
    tpu.vector_store %arg5[%c0_7, %c0_8], %10 {strides = array<i32>} : memref<48x32xf32, #tpu.memory_space<vmem>>, vector<48x32xf32>,
    return
  }
  func.func @transform_0(%arg0: i32, %arg1: i32) -> (i32, i32) {
    %c0_i32 = arith.constant 0 : i32
    %c0_i32_0 = arith.constant 0 : i32
    return %arg1, %c0_i32 : i32, i32
  }
  func.func @transform_1(%arg0: i32, %arg1: i32) -> (i32, i32) {
    %c0_i32 = arith.constant 0 : i32
    %c0_i32_0 = arith.constant 0 : i32
    return %c0_i32, %arg0 : i32, i32
  }
  func.func @transform_2(%arg0: i32, %arg1: i32) -> (i32, i32) {
    %c0_i32 = arith.constant 0 : i32
    %c0_i32_0 = arith.constant 0 : i32
    return %c0_i32, %arg0 : i32, i32
  }
  func.func @transform_3(%arg0: i32, %arg1: i32) -> (i32, i32) {
    %c0_i32 = arith.constant 0 : i32
    return %arg1, %arg0 : i32, i32
  }
}

</mosaic_0001>

<bundles_post_ra>
// kernel: tpu_custom_call.1
= control target key start
LH: loop header
LB: loop body
LE: loop exit
PB: predicated region body
PF: predicated region fallthrough
CT: control target
= control target key end

     0   :  { %v181_v0 = vmov 0.0   ;;  %vm182_vm0 = vmmov 0   ;;  %vm51_vm1 = vcmask 130048   ;;  %vm136_vm2 = vcmask 261120   ;;  %s242_s1 = inlined_call_operand.vmem [shape: bf16[16,32], index: 1, kind: input, shape index: {}]   ;;  %s243_s0 = inlined_call_operand.vmem [shape: bf16[48,16], index: 0, kind: input, shape index: {}]   ;;  %s244_s2 = inlined_call_operand.vmem [shape: f32[1,32], index: 2, kind: input, shape index: {}]   ;;  %s245_s3 = inlined_call_operand.vmem [shape: f32[48,32], index: 3, kind: output, shape index: {}]  }
   0x1   :  { %173 = vmatprep.subr.bf16.mxu1 %v181_v0  ;;  %v177_v1 = vld [vmem:[%s242_s1] sm:$0xff]   ;;  %165 = vmatprep.mubr.msk.bf16.mxu1 %vm182_vm0, %v181_v0  ;;  %v178_v2 = vld [vmem:[%s243_s0 + $0x8] sm:$0xff]   ;;  %v180_v4 = vld [vmem:[%s243_s0 + $0x10] sm:$0xff]  }
   0x2   :  { %159 = vmatprep.subr.bf16.mxu0 %v181_v0  ;;  %161 = vmatprep.mubr.msk.bf16.mxu0 %vm182_vm0, %v181_v0  ;;  %v179_v3 = vld [vmem:[%s243_s0] sm:$0xff]  }
   0x3   :  { %174 = vmatpush3.bf16.msra.mxu1 %v177_v1  ;;  %160 = vmatpush3.bf16.msra.mxu0 %v177_v1  ;;  %v147_v5 = vld [vmem:[%s244_s2] ss:$0 sm:$0xff] }
   0x6   :  { %166 = vmatmul.mubr.msk.bf16.vlgmr.msra.gmra.mrb[0].mxu1 %vm51_vm1, %v178_v2  ;;  %162 = vmatmul.mubr.msk.bf16.vlgmr.msra.gmra.mrb[0].mxu0 %vm51_vm1, %v179_v3 }
   0x7   :  { %169 = vmatprep.mubr.msk.bf16.mxu1 %vm182_vm0, %v181_v0 }
   0xe   :  { %170 = vmatmul.mubr.msk.bf16.gmra.mrb[4].mxu1 %vm51_vm1, %v180_v4 }
  0xd9   :  { %v103_v6 = vpop.f32.mrb[0].mxu1  ;;  %v95_v7 = vpop.f32.mrb[0].mxu0 }
  0xda   :  { %v104_v8 = vadd.f32 %v147_v5, %v103_v6  ;;  %v167_v9 = vpop.f32.mrb[1].mxu1  ;;  %v96_v10 = vadd.f32 %v147_v5, %v95_v7  ;;  %v163_v11 = vpop.f32.mrb[1].mxu0 }
  0xdb   :  { %v106_v12 = vpop.f32.mrb[2].mxu1  ;;  %v98_v13 = vpop.f32.mrb[2].mxu0 }
  0xdc   :  { %vm120_vm3 = vcmp.ge.f32.partialorder %v104_v8, 0.0  ;;  %v126_v14 = vmul.f32 0.01, %v104_v8  ;;  %v107_v15 = vadd.f32 %v147_v5, %v106_v12  ;;  %v168_v16 = vpop.f32.mrb[3].mxu1  ;;  %vm118_vm4 = vcmp.ge.f32.partialorder %v96_v10, 0.0  ;;  %v164_v17 = vpop.f32.mrb[3].mxu0 }
  0xdd   :  { %v124_v18 = vmul.f32 0.01, %v96_v10  ;;  %v99_v19 = vadd.f32 %v147_v5, %v98_v13 }
  0xde   :  { %v132_v20 = vsel %vm120_vm3, %v104_v8, %v126_v14  ;;  %vm121_vm5 = vcmp.ge.f32.partialorder %v107_v15, 0.0  ;;  %v127_v21 = vmul.f32 0.01, %v107_v15 }
  0xdf   :  { %139 = vst.msk [vmem:[%s245_s3 + $0x10] sm:$0xff] %vm136_vm2, %v132_v20  ;;  %v130_v22 = vsel %vm118_vm4, %v96_v10, %v124_v18  ;;  %vm119_vm6 = vcmp.ge.f32.partialorder %v99_v19, 0.0  ;;  %v125_v23 = vmul.f32 0.01, %v99_v19 }
  0xe0   :  { %v133_v24 = vsel %vm121_vm5, %v107_v15, %v127_v21  ;;  %137 = vst.msk [vmem:[%s245_s3] sm:$0xff] %vm136_vm2, %v130_v22 }
  0xe1   :  { %140 = vst.msk [vmem:[%s245_s3 + $0x18] sm:$0xff] %vm136_vm2, %v133_v24  ;;  %v131_v25 = vsel %vm119_vm6, %v99_v19, %v125_v23  ;;  %v111_v26 = vpop.f32.mrb[4].mxu1 }
  0xe2   :  { %138 = vst.msk [vmem:[%s245_s3 + $0x8] sm:$0xff] %vm136_vm2, %v131_v25  ;;  %v112_v27 = vadd.f32 %v147_v5, %v111_v26  ;;  %v171_v28 = vpop.f32.mrb[5].mxu1 }
  0xe3   :  { %v114_v29 = vpop.f32.mrb[6].mxu1 }
  0xe4   :  { %vm122_vm7 = vcmp.ge.f32.partialorder %v112_v27, 0.0  ;;  %v128_v30 = vmul.f32 0.01, %v112_v27  ;;  %v115_v31 = vadd.f32 %v147_v5, %v114_v29  ;;  %v172_v32 = vpop.f32.mrb[7].mxu1 }
  0xe6   :  { %v134_v33 = vsel %vm122_vm7, %v112_v27, %v128_v30  ;;  %vm123_vm8 = vcmp.ge.f32.partialorder %v115_v31, 0.0  ;;  %v129_v34 = vmul.f32 0.01, %v115_v31 }
  0xe7   :  { %141 = vst.msk [vmem:[%s245_s3 + $0x20] sm:$0xff] %vm136_vm2, %v134_v33 }
  0xe8   :  { %v135_v35 = vsel %vm123_vm8, %v115_v31, %v129_v34 }
  0xe9   :  { %142 = vst.msk [vmem:[%s245_s3 + $0x28] sm:$0xff] %vm136_vm2, %v135_v35 }

</bundles_post_ra>
